<compile_context>
chip_gen: v7x
topology: tpu7x:2x2x1
jax: 0.10.0
libtpu: 0.0.40
codegen_flags: <defaults>
</compile_context>

<pallas_src>
import functools

import jax
import jax.numpy as jnp
from jax import lax
from jax.experimental import pallas as pl
from jax.experimental.pallas import tpu as pltpu

_NCLS = 10          # real number of classes
_NCLS_PAD = 128     # lane-dense padded class dim
_NEG_BIG = -1e30    # padding bias -> padded logits give exactly-zero probability


def _round_up(n, m):
    return ((n + m - 1) // m) * m


def _pick_tile_b(b):
    """Largest batch tile (multiple of 16, <= 2048) with small zero-row padding waste."""
    b16 = _round_up(b, 16)
    if b16 <= 2048:
        return b16
    for t in (2048, 1024, 512, 256, 128):
        if ((-b) % t) * 16 <= b:      # padded rows <= ~6.25% of real rows
            return t
    return 128


def kd_kernel(x_ref, w1_ref, b1_ref, w2_ref, b2_ref, cmask_ref, out_ref,
              *, inv_temp, batch, tile_b, needs_row_mask):
    i = pl.program_id(0)

    # ---- fused first layer: one (TB,784)@(784,256) bf16 matmul for both MLPs
    h = jnp.dot(x_ref[...], w1_ref[...], preferred_element_type=jnp.float32)
    h = jnp.maximum(h + b1_ref[...], 0.0)                       # ReLU, f32

    # ---- fused block-diagonal second layer: (TB,256)@(256,256) bf16 -> [zt | zs]
    z = (jnp.dot(h.astype(jnp.bfloat16), w2_ref[...],
                 preferred_element_type=jnp.float32) + b2_ref[...]) * inv_temp
    zt = z[:, :_NCLS_PAD]                                       # teacher logits / T
    zs = z[:, _NCLS_PAD:]                                       # student logits / T

    # ---- teacher softmax (padded columns -> probability exactly 0)
    m_t = jnp.max(zt, axis=-1, keepdims=True)
    e_t = jnp.exp(zt - m_t)
    s_t = jnp.sum(e_t, axis=-1, keepdims=True)
    p = e_t / s_t                                               # teacher_probs
    log_p = (zt - m_t) - jnp.log(s_t)                           # log(teacher_probs)

    # ---- student softmax
    m_s = jnp.max(zs, axis=-1, keepdims=True)
    e_s = jnp.exp(zs - m_s)
    s_s = jnp.sum(e_s, axis=-1, keepdims=True)
    q = e_s / s_s                                               # student_probs

    # ---- reproduce F.log_softmax(student_probs, -1) (log-softmax of *probs*, as in
    #      the reference PyTorch code), restricted to real classes via additive mask.
    q_m = q + cmask_ref[...]                                    # (1,128): 0 real / -1e30 pad
    m_q = jnp.max(q_m, axis=-1, keepdims=True)
    e_q = jnp.exp(q_m - m_q)
    s_q = jnp.sum(e_q, axis=-1, keepdims=True)
    log_q = q - (m_q + jnp.log(s_q))

    # ---- KL with xlogy semantics; padded classes have p == 0 and drop out here.
    kl = jnp.where(p > 0.0, p * (log_p - log_q), 0.0)

    def _tile_partial(kl_vals):
        # (TB,128) -> (8,128): sublane-group partial sums (pure VPU adds); the single
        # cross-lane/sublane reduction happens once in the wrapper.
        return kl_vals.reshape(tile_b // 8, 8, _NCLS_PAD).sum(axis=0)

    if needs_row_mask:
        # Only the last tile can contain zero-padded batch rows.
        last = pl.num_programs(0) - 1

        @pl.when(i != last)
        def _():
            out_ref[...] = _tile_partial(kl)

        @pl.when(i == last)
        def _():
            row = lax.broadcasted_iota(jnp.int32, kl.shape, 0) + i * tile_b
            out_ref[...] = _tile_partial(jnp.where(row < batch, kl, 0.0))
    else:
        out_ref[...] = _tile_partial(kl)


def init_simple_model(key):
    """Deterministic init of a SimpleModel: fc1 (784->128), fc2 (128->10)."""
    k1, k2, k3, k4 = jax.random.split(key, 4)
    d_in, d_h, d_out = 28 * 28, 128, 10
    lim1 = 1.0 / jnp.sqrt(d_in)
    lim2 = 1.0 / jnp.sqrt(d_h)
    w1 = jax.random.uniform(k1, (d_in, d_h), jnp.float32, -lim1, lim1)
    b1 = jax.random.uniform(k2, (1, d_h), jnp.float32, -lim1, lim1)
    w2 = jax.random.uniform(k3, (d_h, d_out), jnp.float32, -lim2, lim2)
    b2 = jax.random.uniform(k4, (1, d_out), jnp.float32, -lim2, lim2)
    return (w1, b1, w2, b2)


def kd_forward(x, teacher_params, student_params, temperature=1.0):
    wt1, bt1, wt2, bt2 = teacher_params
    ws1, bs1, ws2, bs2 = student_params
    d_in = wt1.shape[0]
    hidden = wt1.shape[1]

    # --- batch tiling (multiple of 16, <= 2048, low padding waste) -------------------
    x2d = x.reshape(-1, d_in)
    b = x2d.shape[0]
    tile_b = _pick_tile_b(b)
    b_pad = _round_up(b, tile_b)
    num_tiles = b_pad // tile_b
    needs_row_mask = (b_pad != b)

    # cast to bf16 *before* padding to halve pre-kernel HBM traffic
    x2 = jnp.pad(x2d.astype(jnp.bfloat16), ((0, b_pad - b), (0, 0)))

    # --- fused first layer: one N = 2*hidden bf16 matmul ----------------------------
    w1cat = jnp.concatenate([wt1, ws1], axis=1).astype(jnp.bfloat16)   # (784, 256)
    b1cat = jnp.concatenate([bt1, bs1], axis=1).astype(jnp.float32)    # (1, 256)

    # --- fused block-diagonal second layer (class dim lane-padded to 128) -----------
    def _pad_head(w2, b2):
        w2p = jnp.pad(w2.astype(jnp.float32), ((0, 0), (0, _NCLS_PAD - w2.shape[1])))
        b2p = jnp.pad(b2.astype(jnp.float32), ((0, 0), (0, _NCLS_PAD - b2.shape[1])),
                      constant_values=_NEG_BIG)
        return w2p, b2p

    wt2p, bt2p = _pad_head(wt2, bt2)
    ws2p, bs2p = _pad_head(ws2, bs2)
    zpad = jnp.zeros((hidden, _NCLS_PAD), jnp.float32)
    w2blk = jnp.concatenate(
        [jnp.concatenate([wt2p, zpad], axis=1),
         jnp.concatenate([zpad, ws2p], axis=1)], axis=0).astype(jnp.bfloat16)  # (256,256)
    b2blk = jnp.concatenate([bt2p, bs2p], axis=1)                              # (1,256)

    # additive class mask: 0 for real classes, -1e30 for padded lanes
    cmask = jnp.where(jnp.arange(_NCLS_PAD) < _NCLS, 0.0, _NEG_BIG
                      ).astype(jnp.float32)[None, :]                           # (1,128)

    kernel = functools.partial(
        kd_kernel,
        inv_temp=float(1.0 / temperature),
        batch=int(b),
        tile_b=int(tile_b),
        needs_row_mask=bool(needs_row_mask),
    )

    def resident(shape):
        return pl.BlockSpec(shape, lambda i: (0, 0))

    # --- VMEM budget from actual footprint (+headroom), not a blanket number --------
    vmem_bytes = (
        2 * tile_b * d_in * 2                              # double-buffered bf16 x tile
        + 2 * (w1cat.size * 2 + b1cat.size * 4
               + w2blk.size * 2 + b2blk.size * 4 + cmask.size * 4)   # resident weights
        + 2 * 8 * _NCLS_PAD * 4                            # double-buffered out block
        + 2 * tile_b * 2 * hidden * 4                      # h / z f32 temporaries
        + 10 * tile_b * _NCLS_PAD * 4                      # softmax/KL f32 temporaries
    )
    vmem_limit = int(min(64 << 20, max(16 << 20, vmem_bytes + (8 << 20))))

    flops = (2 * b_pad * d_in * (2 * hidden)
             + 2 * b_pad * (2 * hidden) * (2 * _NCLS_PAD))
    bytes_accessed = (x2.size * 2 + w1cat.size * 2 + b1cat.size * 4
                      + w2blk.size * 2 + b2blk.size * 4 + cmask.size * 4
                      + num_tiles * 8 * _NCLS_PAD * 4)

    partials = pl.pallas_call(
        kernel,
        out_shape=jax.ShapeDtypeStruct((num_tiles * 8, _NCLS_PAD), jnp.float32),
        grid_spec=pltpu.PrefetchScalarGridSpec(
            num_scalar_prefetch=0,
            grid=(num_tiles,),
            in_specs=[
                pl.BlockSpec((tile_b, d_in), lambda i: (i, 0)),   # x tile (streamed)
                resident((d_in, 2 * hidden)),                     # fused W1 (bf16)
                resident((1, 2 * hidden)),                        # fused b1 (f32)
                resident((2 * hidden, 2 * _NCLS_PAD)),            # block-diag W2 (bf16)
                resident((1, 2 * _NCLS_PAD)),                     # fused padded b2 (f32)
                resident((1, _NCLS_PAD)),                         # class mask
            ],
            out_specs=pl.BlockSpec((8, _NCLS_PAD), lambda i: (i, 0)),
        ),
        compiler_params=pltpu.CompilerParams(
            dimension_semantics=("parallel",),       # lets v7x split the batch grid
            vmem_limit_bytes=vmem_limit,
        ),
        cost_estimate=pl.CostEstimate(
            flops=int(flops),
            transcendentals=int(3 * b_pad * _NCLS_PAD),
            bytes_accessed=int(bytes_accessed),
        ),
    )(x2, w1cat, b1cat, w2blk, b2blk, cmask)

    # single final reduction + batchmean scaling in the wrapper
    return jnp.sum(partials) * (1.0 / b)


if __name__ == "__main__":
    key = jax.random.PRNGKey(0)
    k_x, k_t, k_s = jax.random.split(key, 3)

    # Small batch of MNIST-shaped inputs (NCHW like PyTorch).
    x = jax.random.normal(k_x, (2, 1, 28, 28), dtype=jnp.float32)

    teacher_params = init_simple_model(k_t)
    student_params = init_simple_model(k_s)

    loss = kd_forward(x, teacher_params, student_params, temperature=1.0)
    jax.block_until_ready(loss)
    assert bool(jnp.isfinite(loss)), f"non-finite loss: {loss}"
    print("KERNEL_OK")
</pallas_src>

<mosaic_0001>
module attributes {stable_mosaic.version = 11 : i64} {
  func.func @kd_kernel(%arg0: i32, %arg1: memref<16x784xbf16, #tpu.memory_space<vmem>>, %arg2: memref<784x256xbf16, #tpu.memory_space<vmem>>, %arg3: memref<1x256xf32, #tpu.memory_space<vmem>>, %arg4: memref<256x256xbf16, #tpu.memory_space<vmem>>, %arg5: memref<1x256xf32, #tpu.memory_space<vmem>>, %arg6: memref<1x128xf32, #tpu.memory_space<vmem>>, %arg7: memref<8x128xf32, #tpu.memory_space<vmem>>) attributes {dimension_semantics = [#tpu.dimension_semantics<parallel>], iteration_bounds = array<i64: 1>, scalar_prefetch = 0 : i64, scratch_operands = 0 : i64, tpu.core_type = #tpu.core_type<tc>, window_params = [{transform_indices = @transform_0, window_bounds = array<i64: 16, 784>}, {pipeline_mode = #tpu.pipeline_mode<synchronous>, transform_indices = @transform_1, window_bounds = array<i64: 784, 256>}, {pipeline_mode = #tpu.pipeline_mode<synchronous>, transform_indices = @transform_2, window_bounds = array<i64: 1, 256>}, {pipeline_mode = #tpu.pipeline_mode<synchronous>, transform_indices = @transform_3, window_bounds = array<i64: 256, 256>}, {pipeline_mode = #tpu.pipeline_mode<synchronous>, transform_indices = @transform_4, window_bounds = array<i64: 1, 256>}, {pipeline_mode = #tpu.pipeline_mode<synchronous>, transform_indices = @transform_5, window_bounds = array<i64: 1, 128>}, {transform_indices = @transform_6, window_bounds = array<i64: 8, 128>}]} {
    %c0 = arith.constant 0 : index
    %c0_0 = arith.constant 0 : index
    %0 = vector.load %arg1[%c0, %c0_0] : memref<16x784xbf16, #tpu.memory_space<vmem>>, vector<16x784xbf16>
    %c0_1 = arith.constant 0 : index
    %c0_2 = arith.constant 0 : index
    %1 = vector.load %arg2[%c0_1, %c0_2] : memref<784x256xbf16, #tpu.memory_space<vmem>>, vector<784x256xbf16>
    %cst = arith.constant dense<0.000000e+00> : vector<16x256xf32>
    %2 = tpu.matmul %0, %1, %cst {dimension_numbers = #tpu.dot_dimension_numbers<[1], [0], [0], [1], [0, 0, 1, 1], [], []>} : vector<16x784xbf16>, vector<784x256xbf16>, vector<16x256xf32> -> vector<16x256xf32>
    %c0_3 = arith.constant 0 : index
    %c0_4 = arith.constant 0 : index
    %3 = vector.load %arg3[%c0_3, %c0_4] : memref<1x256xf32, #tpu.memory_space<vmem>>, vector<1x256xf32>
    %4 = vector.broadcast %3 : vector<1x256xf32> to vector<16x256xf32>
    %5 = arith.addf %2, %4 : vector<16x256xf32>
    %cst_5 = arith.constant 0.000000e+00 : f32
    %6 = vector.broadcast %cst_5 : f32 to vector<16x256xf32>
    %7 = arith.maximumf %5, %6 : vector<16x256xf32>
    %8 = arith.truncf %7 : vector<16x256xf32> to vector<16x256xbf16>
    %c0_6 = arith.constant 0 : index
    %c0_7 = arith.constant 0 : index
    %9 = vector.load %arg4[%c0_6, %c0_7] : memref<256x256xbf16, #tpu.memory_space<vmem>>, vector<256x256xbf16>
    %cst_8 = arith.constant dense<0.000000e+00> : vector<16x256xf32>
    %10 = tpu.matmul %8, %9, %cst_8 {dimension_numbers = #tpu.dot_dimension_numbers<[1], [0], [0], [1], [0, 0, 1, 1], [], []>} : vector<16x256xbf16>, vector<256x256xbf16>, vector<16x256xf32> -> vector<16x256xf32>
    %c0_9 = arith.constant 0 : index
    %c0_10 = arith.constant 0 : index
    %11 = vector.load %arg5[%c0_9, %c0_10] : memref<1x256xf32, #tpu.memory_space<vmem>>, vector<1x256xf32>
    %12 = vector.broadcast %11 : vector<1x256xf32> to vector<16x256xf32>
    %13 = arith.addf %10, %12 : vector<16x256xf32>
    %cst_11 = arith.constant 1.000000e+00 : f32
    %14 = vector.broadcast %cst_11 : f32 to vector<16x256xf32>
    %15 = arith.mulf %13, %14 : vector<16x256xf32>
    %16 = vector.extract_strided_slice %15 {offsets = [0, 0], sizes = [16, 128], strides = [1, 1]} : vector<16x256xf32> to vector<16x128xf32>
    %17 = vector.extract_strided_slice %15 {offsets = [0, 128], sizes = [16, 128], strides = [1, 1]} : vector<16x256xf32> to vector<16x128xf32>
    %cst_12 = arith.constant dense<0xFF800000> : vector<16xf32>
    %18 = vector.multi_reduction <maximumf>, %16, %cst_12 [1] : vector<16x128xf32> to vector<16xf32>
    %19 = vector.shape_cast %18 : vector<16xf32> to vector<16x1xf32>
    %20 = vector.broadcast %19 : vector<16x1xf32> to vector<16x128xf32>
    %21 = arith.subf %16, %20 : vector<16x128xf32>
    %22 = math.exp %21 : vector<16x128xf32>
    %cst_13 = arith.constant dense<0.000000e+00> : vector<16xf32>
    %23 = vector.multi_reduction <add>, %22, %cst_13 [1] : vector<16x128xf32> to vector<16xf32>
    %24 = vector.shape_cast %23 : vector<16xf32> to vector<16x1xf32>
    %25 = vector.broadcast %24 : vector<16x1xf32> to vector<16x128xf32>
    %26 = arith.divf %22, %25 : vector<16x128xf32>
    %27 = vector.broadcast %19 : vector<16x1xf32> to vector<16x128xf32>
    %28 = arith.subf %16, %27 : vector<16x128xf32>
    %29 = math.log %24 : vector<16x1xf32>
    %30 = vector.broadcast %29 : vector<16x1xf32> to vector<16x128xf32>
    %31 = arith.subf %28, %30 : vector<16x128xf32>
    %cst_14 = arith.constant dense<0xFF800000> : vector<16xf32>
    %32 = vector.multi_reduction <maximumf>, %17, %cst_14 [1] : vector<16x128xf32> to vector<16xf32>
    %33 = vector.shape_cast %32 : vector<16xf32> to vector<16x1xf32>
    %34 = vector.broadcast %33 : vector<16x1xf32> to vector<16x128xf32>
    %35 = arith.subf %17, %34 : vector<16x128xf32>
    %36 = math.exp %35 : vector<16x128xf32>
    %cst_15 = arith.constant dense<0.000000e+00> : vector<16xf32>
    %37 = vector.multi_reduction <add>, %36, %cst_15 [1] : vector<16x128xf32> to vector<16xf32>
    %38 = vector.shape_cast %37 : vector<16xf32> to vector<16x1xf32>
    %39 = vector.broadcast %38 : vector<16x1xf32> to vector<16x128xf32>
    %40 = arith.divf %36, %39 : vector<16x128xf32>
    %c0_16 = arith.constant 0 : index
    %c0_17 = arith.constant 0 : index
    %41 = vector.load %arg6[%c0_16, %c0_17] : memref<1x128xf32, #tpu.memory_space<vmem>>, vector<1x128xf32>
    %42 = vector.broadcast %41 : vector<1x128xf32> to vector<16x128xf32>
    %43 = arith.addf %40, %42 : vector<16x128xf32>
    %cst_18 = arith.constant dense<0xFF800000> : vector<16xf32>
    %44 = vector.multi_reduction <maximumf>, %43, %cst_18 [1] : vector<16x128xf32> to vector<16xf32>
    %45 = vector.shape_cast %44 : vector<16xf32> to vector<16x1xf32>
    %46 = vector.broadcast %45 : vector<16x1xf32> to vector<16x128xf32>
    %47 = arith.subf %43, %46 : vector<16x128xf32>
    %48 = math.exp %47 : vector<16x128xf32>
    %cst_19 = arith.constant dense<0.000000e+00> : vector<16xf32>
    %49 = vector.multi_reduction <add>, %48, %cst_19 [1] : vector<16x128xf32> to vector<16xf32>
    %50 = vector.shape_cast %49 : vector<16xf32> to vector<16x1xf32>
    %51 = math.log %50 : vector<16x1xf32>
    %52 = arith.addf %45, %51 : vector<16x1xf32>
    %53 = vector.broadcast %52 : vector<16x1xf32> to vector<16x128xf32>
    %54 = arith.subf %40, %53 : vector<16x128xf32>
    %cst_20 = arith.constant 0.000000e+00 : f32
    %55 = vector.broadcast %cst_20 : f32 to vector<16x128xf32>
    %56 = arith.cmpf ogt, %26, %55 : vector<16x128xf32>
    %57 = arith.subf %31, %54 : vector<16x128xf32>
    %58 = arith.mulf %26, %57 : vector<16x128xf32>
    %cst_21 = arith.constant 0.000000e+00 : f32
    %59 = vector.broadcast %cst_21 : f32 to vector<16x128xf32>
    %60 = arith.select %56, %58, %59 : vector<16x128xi1>, vector<16x128xf32>
    %c0_i32 = arith.constant 0 : i32
    %61 = arith.cmpi ne, %arg0, %c0_i32 : i32
    %62 = arith.extui %61 : i1 to i32
    %c0_i32_22 = arith.constant 0 : i32
    %63 = arith.cmpi ne, %62, %c0_i32_22 : i32
    scf.if %63 {
      %67 = vector.shape_cast %60 : vector<16x128xf32> to vector<2x8x128xf32>
      %cst_25 = arith.constant dense<0.000000e+00> : vector<8x128xf32>
      %68 = vector.multi_reduction <add>, %67, %cst_25 [0] : vector<2x8x128xf32> to vector<8x128xf32>
      %c0_26 = arith.constant 0 : index
      %c0_27 = arith.constant 0 : index
      %69 = vector.load %arg7[%c0_26, %c0_27] : memref<8x128xf32, #tpu.memory_space<vmem>>, vector<8x128xf32>
      tpu.vector_store %arg7[%c0_26, %c0_27], %68 {strides = array<i32>} : memref<8x128xf32, #tpu.memory_space<vmem>>, vector<8x128xf32>,
    } else {
    }
    %c0_i32_23 = arith.constant 0 : i32
    %64 = arith.cmpi eq, %arg0, %c0_i32_23 : i32
    %65 = arith.extui %64 : i1 to i32
    %c0_i32_24 = arith.constant 0 : i32
    %66 = arith.cmpi ne, %65, %c0_i32_24 : i32
    scf.if %66 {
      %67 = tpu.iota {dimensions = array<i32: 0>} : vector<16x128xi32>
      %c16_i32 = arith.constant 16 : i32
      %68 = arith.muli %arg0, %c16_i32 : i32
      %69 = vector.broadcast %68 : i32 to vector<16x128xi32>
      %70 = arith.addi %67, %69 : vector<16x128xi32>
      %c2_i32 = arith.constant 2 : i32
      %71 = vector.broadcast %c2_i32 : i32 to vector<16x128xi32>
      %72 = arith.cmpi slt, %70, %71 : vector<16x128xi32>
      %cst_25 = arith.constant 0.000000e+00 : f32
      %73 = vector.broadcast %cst_25 : f32 to vector<16x128xf32>
      %74 = arith.select %72, %60, %73 : vector<16x128xi1>, vector<16x128xf32>
      %75 = vector.shape_cast %74 : vector<16x128xf32> to vector<2x8x128xf32>
      %cst_26 = arith.constant dense<0.000000e+00> : vector<8x128xf32>
      %76 = vector.multi_reduction <add>, %75, %cst_26 [0] : vector<2x8x128xf32> to vector<8x128xf32>
      %c0_27 = arith.constant 0 : index
      %c0_28 = arith.constant 0 : index
      %77 = vector.load %arg7[%c0_27, %c0_28] : memref<8x128xf32, #tpu.memory_space<vmem>>, vector<8x128xf32>
      tpu.vector_store %arg7[%c0_27, %c0_28], %76 {strides = array<i32>} : memref<8x128xf32, #tpu.memory_space<vmem>>, vector<8x128xf32>,
    } else {
    }
    return
  }
  func.func @transform_0(%arg0: i32) -> (i32, i32) {
    %c0_i32 = arith.constant 0 : i32
    %c0_i32_0 = arith.constant 0 : i32
    return %arg0, %c0_i32 : i32, i32
  }
  func.func @transform_1(%arg0: i32) -> (i32, i32) {
    %c0_i32 = arith.constant 0 : i32
    %c0_i32_0 = arith.constant 0 : i32
    %c0_i32_1 = arith.constant 0 : i32
    return %c0_i32, %c0_i32_0 : i32, i32
  }
  func.func @transform_2(%arg0: i32) -> (i32, i32) {
    %c0_i32 = arith.constant 0 : i32
    %c0_i32_0 = arith.constant 0 : i32
    %c0_i32_1 = arith.constant 0 : i32
    return %c0_i32, %c0_i32_0 : i32, i32
  }
  func.func @transform_3(%arg0: i32) -> (i32, i32) {
    %c0_i32 = arith.constant 0 : i32
    %c0_i32_0 = arith.constant 0 : i32
    %c0_i32_1 = arith.constant 0 : i32
    return %c0_i32, %c0_i32_0 : i32, i32
  }
  func.func @transform_4(%arg0: i32) -> (i32, i32) {
    %c0_i32 = arith.constant 0 : i32
    %c0_i32_0 = arith.constant 0 : i32
    %c0_i32_1 = arith.constant 0 : i32
    return %c0_i32, %c0_i32_0 : i32, i32
  }
  func.func @transform_5(%arg0: i32) -> (i32, i32) {
    %c0_i32 = arith.constant 0 : i32
    %c0_i32_0 = arith.constant 0 : i32
    %c0_i32_1 = arith.constant 0 : i32
    return %c0_i32, %c0_i32_0 : i32, i32
  }
  func.func @transform_6(%arg0: i32) -> (i32, i32) {
    %c0_i32 = arith.constant 0 : i32
    %c0_i32_0 = arith.constant 0 : i32
    return %arg0, %c0_i32 : i32, i32
  }
}

</mosaic_0001>

<bundles_post_ra>
// kernel: tpu_custom_call.1
= control target key start
LH: loop header
LB: loop body
LE: loop exit
PB: predicated region body
PF: predicated region fallthrough
CT: control target
= control target key end

     0   :  { %11 = vsyncpa [#allocation3], 0  ;;  %s1847_s0 = inlined_call_operand.hbm [shape: bf16[16,784], index: 0, kind: input, shape index: {}]   ;;  %s1848_s1 = inlined_call_operand.hbm [shape: bf16[784,256], index: 1, kind: input, shape index: {}]   ;;  %s1849_s2 = inlined_call_operand.vmem [shape: f32[1,256], index: 2, kind: input, shape index: {}]   ;;  %s1850_s3 = inlined_call_operand.hbm [shape: bf16[256,256], index: 3, kind: input, shape index: {}]   ;;  %s1851_s4 = inlined_call_operand.vmem [shape: f32[1,256], index: 4, kind: input, shape index: {}]   ;;  %s1852_s5 = inlined_call_operand.vmem [shape: f32[1,128], index: 5, kind: input, shape index: {}]   ;;  %s1853_s6 = inlined_call_operand.hbm [shape: f32[8,128], index: 6, kind: output, shape index: {}]  }
   0x1   :  { %12 = vsyncpa [#allocation6], 0 }
   0x2   :  { %13 = vsyncpa [#allocation4], 0  ;;  %s1735_s21 = smov [#allocation5]   ;;  %s1641_s25 = scalar_lea.hbm %s1848_s1, 12544 }
   0x3   :  { %s31_s22 = sshll.u32 %s1735_s21, 4  ;;  %p1642_p0 = scmp.ne.s32.totalorder %s1848_s1, %s1641_s25  ;;  %s32_s22 = int_to_ptr.vmem [resolvable:$true] %s31_s22 }
   0x4   :  { %p1645_p1 = scmp.lt.u32.totalorder %s1641_s25, %s1848_s1 }
   0x6   :  { %p1647_p2 = pnand %p1645_p1, %p1642_p0 }
   0x8   :  { %1650 = shalt.err (!%p1647_p2)
}
   0x9   :  { %s1651_s30 = scalar_lea.vmem %s32_s22, 12544  ;;  %p1656_p4 = scmp.lt.s32.totalorder %s32_s22, %s32_s22 }
   0xa   :  { %p1652_p3 = scmp.ne.s32.totalorder %s32_s22, %s1651_s30  ;;  %p1657_p5 = scmp.lt.s32.totalorder %s1651_s30, %s1651_s30 }
   0xc   :  { %p1658_p6 = por %p1657_p5, %p1656_p4 }
   0xe   :  { %p1659_p7 = pnand %p1658_p6, %p1652_p3 }
  0x10   :  { %1662 = shalt.err (!%p1659_p7)
}
  0x11   :  { %s1736_s7 = smov 128   ;;  %s1737_s8 = smov 8  }
  0x12   :  { %37 = dma.hbm_to_vmem [thread:$0]  %s1848_s1, 12544, %s32_s22, [#allocation6], %s1736_s7, %s1736_s7, %s1737_s8  }
  0x13   :  { %s1738_s11 = smov [#allocation2]   ;;  %s1663_s15 = scalar_lea.hbm %s1847_s0, 896 }
  0x14   :  { %s19_s12 = sshll.u32 %s1738_s11, 4  ;;  %p1664_p8 = scmp.ne.s32.totalorder %s1847_s0, %s1663_s15  ;;  %s20_s12 = int_to_ptr.vmem [resolvable:$true] %s19_s12 }
  0x15   :  { %p1667_p9 = scmp.lt.u32.totalorder %s1663_s15, %s1847_s0 }
  0x17   :  { %p1669_p10 = pnand %p1667_p9, %p1664_p8 }
  0x19   :  { %1672 = shalt.err (!%p1669_p10)
}
  0x1a   :  { %s1673_s20 = scalar_lea.vmem %s20_s12, 896  ;;  %p1678_p12 = scmp.lt.s32.totalorder %s20_s12, %s20_s12 }
  0x1b   :  { %p1674_p11 = scmp.ne.s32.totalorder %s20_s12, %s1673_s20  ;;  %p1679_p13 = scmp.lt.s32.totalorder %s1673_s20, %s1673_s20 }
  0x1d   :  { %p1680_p0 = por %p1679_p13, %p1678_p12 }
  0x1f   :  { %p1681_p1 = pnand %p1680_p0, %p1674_p11 }
  0x21   :  { %1684 = shalt.err (!%p1681_p1)
}
  0x22   :  { %s1739_s1 = smov 448   ;;  %s1740_s21 = smov 28  }
  0x23   :  { %25 = dma.hbm_to_vmem [thread:$0]  %s1847_s0, 896, %s20_s12, [#allocation3], %s1739_s1, %s1739_s1, %s1740_s21  }
  0x24   :  { %s1741_s24 = smov [#allocation7]   ;;  %s1685_s28 = scalar_lea.hbm %s1850_s3, 4096 }
  0x25   :  { %s45_s25 = sshll.u32 %s1741_s24, 4  ;;  %p1686_p2 = scmp.ne.s32.totalorder %s1850_s3, %s1685_s28  ;;  %s46_s25 = int_to_ptr.vmem [resolvable:$true] %s45_s25 }
  0x26   :  { %p1689_p3 = scmp.lt.u32.totalorder %s1685_s28, %s1850_s3 }
  0x28   :  { %p1691_p4 = pnand %p1689_p3, %p1686_p2 }
  0x2a   :  { %1694 = shalt.err (!%p1691_p4)
}
  0x2b   :  { %s1695_s11 = scalar_lea.vmem %s46_s25, 4096  ;;  %p1700_p6 = scmp.lt.s32.totalorder %s46_s25, %s46_s25 }
  0x2c   :  { %p1696_p5 = scmp.ne.s32.totalorder %s46_s25, %s1695_s11  ;;  %p1701_p7 = scmp.lt.s32.totalorder %s1695_s11, %s1695_s11 }
  0x2e   :  { %p1702_p8 = por %p1701_p7, %p1700_p6 }
  0x30   :  { %p1703_p9 = pnand %p1702_p8, %p1696_p5 }
  0x32   :  { %1706 = shalt.err (!%p1703_p9)
}
  0x33   :  { %51 = dma.hbm_to_vmem [thread:$0]  %s1850_s3, 4096, %s46_s25, [#allocation6], %s1736_s7, %s1736_s7, %s1737_s8  }
  0x34   :  { %1729 = dma.done.wait [#allocation3], 896  }
  0x35   :  { %1730 = vsyncadd [#allocation3], 4294966400 }
  0x36   :  { %1731 = dma.done.wait [#allocation6], 16640  }
  0x37   :  { %1732 = vsyncadd [#allocation6], 4294950656  ;;  %v1422_v0 = vld [vmem:[#allocation5 + $0x104] ss:$8 sps:$4 sm:$0xff]   ;;  %v1424_v1 = vld [vmem:[#allocation5 + $0x100] ss:$8 sps:$4 sm:$0xff]  }
  0x38   :  { %756 = vmatprep.subr.bf16.mxu0 %v1422_v0  ;;  %v1425_v2 = vld [vmem:[#allocation5 + $0x114] ss:$8 sps:$4 sm:$0xff]   ;;  %v1427_v3 = vld [vmem:[#allocation5 + $0x110] ss:$8 sps:$4 sm:$0xff]   ;;  %v1428_v4 = vld [vmem:[#allocation5 + $0x124] ss:$8 sps:$4 sm:$0xff]  }
  0x39   :  { %757 = vmatpush1.bf16.msra.mxu0 %v1424_v1  ;;  %v1430_v5 = vld [vmem:[#allocation5 + $0x120] ss:$8 sps:$4 sm:$0xff]   ;;  %v1431_v6 = vld [vmem:[#allocation5 + $0x134] ss:$8 sps:$4 sm:$0xff]   ;;  %v1433_v7 = vld [vmem:[#allocation5 + $0x130] ss:$8 sps:$4 sm:$0xff]  }
  0x3a   :  { %758 = vmatprep.subr.bf16.mxu0 %v1425_v2  ;;  %v1434_v8 = vld [vmem:[#allocation5 + $0x144] ss:$8 sps:$4 sm:$0xff]   ;;  %v1436_v9 = vld [vmem:[#allocation5 + $0x140] ss:$8 sps:$4 sm:$0xff]   ;;  %v1437_v10 = vld [vmem:[#allocation5 + $0x154] ss:$8 sps:$4 sm:$0xff]  }
  0x3b   :  { %v1439_v11 = vld [vmem:[#allocation5 + $0x150] ss:$8 sps:$4 sm:$0xff]   ;;  %v1440_v12 = vld [vmem:[#allocation5 + $0x164] ss:$8 sps:$4 sm:$0xff]   ;;  %v1442_v14 = vld [vmem:[#allocation5 + $0x160] ss:$8 sps:$4 sm:$0xff]  }
  0x3c   :  { %v1472_v13 = vld [vmem:[#allocation2 + $0xc] ss:$28 sps:$4 sm:$0xff]   ;;  %v1479_v16 = vld [vmem:[#allocation5 + $0x4] ss:$8 sps:$4 sm:$0xff]   ;;  %v1484_v19 = vld [vmem:[#allocation5] ss:$8 sps:$4 sm:$0xff]  }
  0x3d   :  { %759 = vmatpush1.bf16.msra.mxu0 %v1427_v3  ;;  %v1443_v15 = vld [vmem:[#allocation5 + $0x174] ss:$8 sps:$4 sm:$0xff]   ;;  %788 = vmatprep.mubr.bf16.mxu0 %v1472_v13  ;;  %v1445_v17 = vld [vmem:[#allocation5 + $0x170] ss:$8 sps:$4 sm:$0xff]   ;;  %v1446_v18 = vld [vmem:[#allocation5 + $0x184] ss:$8 sps:$4 sm:$0xff]  }
  0x3e   :  { %760 = vmatprep.subr.bf16.mxu0 %v1428_v4  ;;  %713 = vmatprep.subr.bf16.mxu1 %v1479_v16  ;;  %v1485_v20 = vld [vmem:[#allocation5 + $0x14] ss:$8 sps:$4 sm:$0xff]   ;;  %v1448_v21 = vld [vmem:[#allocation5 + $0x180] ss:$8 sps:$4 sm:$0xff]   ;;  %v1490_v22 = vld [vmem:[#allocation5 + $0x10] ss:$8 sps:$4 sm:$0xff]  }
  0x3f   :  { %714 = vmatpush1.bf16.msra.mxu1 %v1484_v19  ;;  %v1491_v23 = vld [vmem:[#allocation5 + $0x24] ss:$8 sps:$4 sm:$0xff]   ;;  %v1449_v24 = vld [vmem:[#allocation5 + $0x194] ss:$8 sps:$4 sm:$0xff]   ;;  %v1496_v25 = vld [vmem:[#allocation5 + $0x20] ss:$8 sps:$4 sm:$0xff]  }
  0x40   :  { %715 = vmatprep.subr.bf16.mxu1 %v1485_v20  ;;  %v1497_v26 = vld [vmem:[#allocation5 + $0x34] ss:$8 sps:$4 sm:$0xff]   ;;  %v1451_v27 = vld [vmem:[#allocation5 + $0x190] ss:$8 sps:$4 sm:$0xff]   ;;  %v1452_v28 = vld [vmem:[#allocation5 + $0x1a4] ss:$8 sps:$4 sm:$0xff]  }
  0x41   :  { %761 = vmatpush1.bf16.msra.mxu0 %v1430_v5  ;;  %v1502_v29 = vld [vmem:[#allocation5 + $0x30] ss:$8 sps:$4 sm:$0xff]   ;;  %v1503_v30 = vld [vmem:[#allocation5 + $0x44] ss:$8 sps:$4 sm:$0xff]   ;;  %v1454_v31 = vld [vmem:[#allocation5 + $0x1a0] ss:$8 sps:$4 sm:$0xff]  }
  0x42   :  { %762 = vmatprep.subr.bf16.mxu0 %v1431_v6  ;;  %v1455_v32 = vld [vmem:[#allocation5 + $0x1b4] ss:$8 sps:$4 sm:$0xff]   ;;  %v1508_v33 = vld [vmem:[#allocation5 + $0x40] ss:$8 sps:$4 sm:$0xff]   ;;  %v1457_v35 = vld [vmem:[#allocation5 + $0x1b0] ss:$8 sps:$4 sm:$0xff]  }
  0x43   :  { %716 = vmatpush1.bf16.msra.mxu1 %v1490_v22  ;;  %v1509_v34 = vld [vmem:[#allocation5 + $0x54] ss:$8 sps:$4 sm:$0xff]   ;;  %v1458_v36 = vld [vmem:[#allocation5 + $0x1c4] ss:$8 sps:$4 sm:$0xff]   ;;  %v1514_v37 = vld [vmem:[#allocation5 + $0x50] ss:$8 sps:$4 sm:$0xff]  }
  0x44   :  { %717 = vmatprep.subr.bf16.mxu1 %v1491_v23  ;;  %v1515_v38 = vld [vmem:[#allocation5 + $0x64] ss:$8 sps:$4 sm:$0xff]   ;;  %v1460_v39 = vld [vmem:[#allocation5 + $0x1c0] ss:$8 sps:$4 sm:$0xff]   ;;  %v1461_v40 = vld [vmem:[#allocation5 + $0x1d4] ss:$8 sps:$4 sm:$0xff]  }
  0x45   :  { %763 = vmatpush1.bf16.msra.mxu0 %v1433_v7  ;;  %v1520_v41 = vld [vmem:[#allocation5 + $0x60] ss:$8 sps:$4 sm:$0xff]   ;;  %v1521_v42 = vld [vmem:[#allocation5 + $0x74] ss:$8 sps:$4 sm:$0xff]   ;;  %v1463_v43 = vld [vmem:[#allocation5 + $0x1d0] ss:$8 sps:$4 sm:$0xff]  }
  0x46   :  { %764 = vmatprep.subr.bf16.mxu0 %v1434_v8  ;;  %v1464_v44 = vld [vmem:[#allocation5 + $0x1e4] ss:$8 sps:$4 sm:$0xff]   ;;  %v1526_v45 = vld [vmem:[#allocation5 + $0x70] ss:$8 sps:$4 sm:$0xff]   ;;  %v1466_v47 = vld [vmem:[#allocation5 + $0x1e0] ss:$8 sps:$4 sm:$0xff]  }
  0x47   :  { %718 = vmatpush1.bf16.msra.mxu1 %v1496_v25  ;;  %v1527_v46 = vld [vmem:[#allocation5 + $0x84] ss:$8 sps:$4 sm:$0xff]   ;;  %v1467_v48 = vld [vmem:[#allocation5 + $0x1f4] ss:$8 sps:$4 sm:$0xff]   ;;  %v1532_v49 = vld [vmem:[#allocation5 + $0x80] ss:$8 sps:$4 sm:$0xff]  }
  0x48   :  { %719 = vmatprep.subr.bf16.mxu1 %v1497_v26  ;;  %v1533_v50 = vld [vmem:[#allocation5 + $0x94] ss:$8 sps:$4 sm:$0xff]   ;;  %v1469_v51 = vld [vmem:[#allocation5 + $0x1f0] ss:$8 sps:$4 sm:$0xff]   ;;  %v1475_v52 = vld [vmem:[#allocation5 + $0x204] ss:$8 sps:$4 sm:$0xff]  }
  0x49   :  { %765 = vmatpush1.bf16.msra.mxu0 %v1436_v9  ;;  %v1538_v53 = vld [vmem:[#allocation5 + $0x90] ss:$8 sps:$4 sm:$0xff]   ;;  %v1539_v55 = vld [vmem:[#allocation5 + $0xa4] ss:$8 sps:$4 sm:$0xff]   ;;  %v1473_v56 = vld [vmem:[#allocation5 + $0x200] ss:$8 sps:$4 sm:$0xff]  }
  0x4a   :  { %766 = vmatprep.subr.bf16.mxu0 %v1437_v10  ;;  %v1470_v54 = vld [vmem:[#allocation2 + $0x8] ss:$28 sps:$4 sm:$0xff]   ;;  %v1565_v57 = vld [vmem:[#allocation2 + $0x14] ss:$28 sps:$4 sm:$0xff]   ;;  %v1544_v59 = vld [vmem:[#allocation5 + $0xa0] ss:$8 sps:$4 sm:$0xff]  }
  0x4b   :  { %720 = vmatpush1.bf16.msra.mxu1 %v1502_v29  ;;  %v1478_v58 = vld [vmem:[#allocation5 + $0x214] ss:$8 sps:$4 sm:$0xff]   ;;  %v1476_v61 = vld [vmem:[#allocation5 + $0x210] ss:$8 sps:$4 sm:$0xff]   ;;  %v1483_v62 = vld [vmem:[#allocation5 + $0x224] ss:$8 sps:$4 sm:$0xff]  }
  0x4c   :  { %721 = vmatprep.subr.bf16.mxu1 %v1503_v30  ;;  %v1545_v60 = vld [vmem:[#allocation5 + $0xb4] ss:$8 sps:$4 sm:$0xff]   ;;  %v1550_v63 = vld [vmem:[#allocation5 + $0xb0] ss:$8 sps:$4 sm:$0xff]   ;;  %v1577_v0 = vld [vmem:[#allocation2 + $0x4] ss:$28 sps:$4 sm:$0xff]  }
  0x4d   :  { %767 = vmatpush1.bf16.msra.mxu0 %v1439_v11  ;;  %v1551_v1 = vld [vmem:[#allocation5 + $0xc4] ss:$8 sps:$4 sm:$0xff]   ;;  %v1481_v2 = vld [vmem:[#allocation5 + $0x220] ss:$8 sps:$4 sm:$0xff]   ;;  %745 = vmatprep.mubr.bf16.mxu1 %v1577_v0  ;;  %v1489_v3 = vld [vmem:[#allocation5 + $0x234] ss:$8 sps:$4 sm:$0xff]  }
  0x4e   :  { %768 = vmatprep.subr.bf16.mxu0 %v1440_v12  ;;  %v1556_v4 = vld [vmem:[#allocation5 + $0xc0] ss:$8 sps:$4 sm:$0xff]   ;;  %v1557_v5 = vld [vmem:[#allocation5 + $0xd4] ss:$8 sps:$4 sm:$0xff]   ;;  %v1487_v6 = vld [vmem:[#allocation5 + $0x230] ss:$8 sps:$4 sm:$0xff]  }
  0x4f   :  { %722 = vmatpush1.bf16.msra.mxu1 %v1508_v33  ;;  %v1495_v7 = vld [vmem:[#allocation5 + $0x244] ss:$8 sps:$4 sm:$0xff]   ;;  %v1562_v8 = vld [vmem:[#allocation5 + $0xd0] ss:$8 sps:$4 sm:$0xff]   ;;  %v1493_v10 = vld [vmem:[#allocation5 + $0x240] ss:$8 sps:$4 sm:$0xff]  }
  0x50   :  { %723 = vmatprep.subr.bf16.mxu1 %v1509_v34  ;;  %v1566_v9 = vld [vmem:[#allocation5 + $0xe4] ss:$8 sps:$4 sm:$0xff]   ;;  %v1501_v11 = vld [vmem:[#allocation5 + $0x254] ss:$8 sps:$4 sm:$0xff]   ;;  %v1571_v12 = vld [vmem:[#allocation5 + $0xe0] ss:$8 sps:$4 sm:$0xff]  }
  0x51   :  { %769 = vmatpush1.bf16.msra.mxu0 %v1442_v14  ;;  %v1572_v13 = vld [vmem:[#allocation5 + $0xf4] ss:$8 sps:$4 sm:$0xff]   ;;  %v1499_v14 = vld [vmem:[#allocation5 + $0x250] ss:$8 sps:$4 sm:$0xff]   ;;  %v1505_v16 = vld [vmem:[#allocation5 + $0x260] ss:$8 sps:$4 sm:$0xff]  }
  0x52   :  { %770 = vmatprep.subr.bf16.mxu0 %v1443_v15  ;;  %v1507_v15 = vld [vmem:[#allocation5 + $0x264] ss:$8 sps:$4 sm:$0xff]   ;;  %v1513_v19 = vld [vmem:[#allocation5 + $0x274] ss:$8 sps:$4 sm:$0xff]   ;;  %v1511_v23 = vld [vmem:[#allocation5 + $0x270] ss:$8 sps:$4 sm:$0xff]  }
  0x53   :  { %724 = vmatpush1.bf16.msra.mxu1 %v1514_v37  ;;  %v1575_v20 = vld [vmem:[#allocation2] ss:$28 sps:$4 sm:$0xff]   ;;  %v1587_v26 = vld [vmem:[#allocation7 + $0x24] ss:$8 sps:$4 sm:$0xff]   ;;  %v1585_v29 = vld [vmem:[#allocation7 + $0x20] ss:$8 sps:$4 sm:$0xff]  }
  0x54   :  { %725 = vmatprep.subr.bf16.mxu1 %v1515_v38  ;;  %v1584_v22 = vld [vmem:[#allocation7 + $0x14] ss:$8 sps:$4 sm:$0xff]   ;;  %v1582_v25 = vld [vmem:[#allocation7 + $0x10] ss:$8 sps:$4 sm:$0xff]   ;;  %v1593_v34 = vld [vmem:[#allocation7 + $0x44] ss:$8 sps:$4 sm:$0xff]  }
  0x55   :  { %771 = vmatpush1.bf16.msra.mxu0 %v1445_v17  ;;  %v1574_v17 = vld [vmem:[#allocation5 + $0xf0] ss:$8 sps:$4 sm:$0xff]   ;;  %v1590_v30 = vld [vmem:[#allocation7 + $0x34] ss:$8 sps:$4 sm:$0xff]   ;;  %v1588_v33 = vld [vmem:[#allocation7 + $0x30] ss:$8 sps:$4 sm:$0xff]  }
  0x56   :  { %772 = vmatprep.subr.bf16.mxu0 %v1446_v18  ;;  %v1581_v18 = vld [vmem:[#allocation7 + $0x4] ss:$8 sps:$4 sm:$0xff]   ;;  %v1591_v37 = vld [vmem:[#allocation7 + $0x40] ss:$8 sps:$4 sm:$0xff]   ;;  %v1596_v38 = vld [vmem:[#allocation7 + $0x54] ss:$8 sps:$4 sm:$0xff]  }
  0x57   :  { %726 = vmatpush1.bf16.msra.mxu1 %v1520_v41  ;;  %v1594_v41 = vld [vmem:[#allocation7 + $0x50] ss:$8 sps:$4 sm:$0xff]   ;;  %vm709_vm0 = vcmask 130048  }
  0x58   :  { %727 = vmatprep.subr.bf16.mxu1 %v1521_v42  ;;  %v1599_v42 = vld [vmem:[#allocation7 + $0x64] ss:$8 sps:$4 sm:$0xff]   ;;  %v1612_v0 = vld [vmem:[#allocation7 + $0xb0] ss:$8 sps:$4 sm:$0xff]  }
  0x59   :  { %773 = vmatpush1.bf16.msra.mxu0 %v1448_v21  ;;  %v1579_v21 = vld [vmem:[#allocation7] ss:$8 sps:$4 sm:$0xff]  }
  0x5a   :  { %774 = vmatprep.subr.bf16.mxu0 %v1449_v24  ;;  %v1519_v24 = vld [vmem:[#allocation5 + $0x284] ss:$8 sps:$4 sm:$0xff]  }
  0x5b   :  { %728 = vmatpush1.bf16.msra.mxu1 %v1526_v45  ;;  %v1597_v45 = vld [vmem:[#allocation7 + $0x60] ss:$8 sps:$4 sm:$0xff]  }
  0x5c   :  { %729 = vmatprep.subr.bf16.mxu1 %v1527_v46  ;;  %v1602_v46 = vld [vmem:[#allocation7 + $0x74] ss:$8 sps:$4 sm:$0xff]  }
  0x5d   :  { %775 = vmatpush1.bf16.msra.mxu0 %v1451_v27  ;;  %v1517_v27 = vld [vmem:[#allocation5 + $0x280] ss:$8 sps:$4 sm:$0xff]  }
  0x5e   :  { %776 = vmatprep.subr.bf16.mxu0 %v1452_v28  ;;  %v1525_v28 = vld [vmem:[#allocation5 + $0x294] ss:$8 sps:$4 sm:$0xff]  }
  0x5f   :  { %730 = vmatpush1.bf16.msra.mxu1 %v1532_v49  ;;  %v1600_v49 = vld [vmem:[#allocation7 + $0x70] ss:$8 sps:$4 sm:$0xff]  }
  0x60   :  { %731 = vmatprep.subr.bf16.mxu1 %v1533_v50  ;;  %v1605_v50 = vld [vmem:[#allocation7 + $0x84] ss:$8 sps:$4 sm:$0xff]  }
  0x61   :  { %777 = vmatpush1.bf16.msra.mxu0 %v1454_v31  ;;  %v1523_v31 = vld [vmem:[#allocation5 + $0x290] ss:$8 sps:$4 sm:$0xff]  }
  0x62   :  { %778 = vmatprep.subr.bf16.mxu0 %v1455_v32  ;;  %v1531_v32 = vld [vmem:[#allocation5 + $0x2a4] ss:$8 sps:$4 sm:$0xff]  }
  0x63   :  { %732 = vmatpush1.bf16.msra.mxu1 %v1538_v53  ;;  %v1603_v53 = vld [vmem:[#allocation7 + $0x80] ss:$8 sps:$4 sm:$0xff]  }
  0x64   :  { %733 = vmatprep.subr.bf16.mxu1 %v1539_v55  ;;  %v1559_v55 = vld [vmem:[#allocation5 + $0x2f0] ss:$8 sps:$4 sm:$0xff]  }
  0x65   :  { %779 = vmatpush1.bf16.msra.mxu0 %v1457_v35  ;;  %v1529_v35 = vld [vmem:[#allocation5 + $0x2a0] ss:$8 sps:$4 sm:$0xff]  }
  0x66   :  { %780 = vmatprep.subr.bf16.mxu0 %v1458_v36  ;;  %v1537_v36 = vld [vmem:[#allocation5 + $0x2b4] ss:$8 sps:$4 sm:$0xff]  }
  0x67   :  { %734 = vmatpush1.bf16.msra.mxu1 %v1544_v59  ;;  %v1611_v59 = vld [vmem:[#allocation7 + $0xa4] ss:$8 sps:$4 sm:$0xff]  }
  0x68   :  { %735 = vmatprep.subr.bf16.mxu1 %v1545_v60  ;;  %v1568_v60 = vld [vmem:[#allocation5 + $0x300] ss:$8 sps:$4 sm:$0xff]  }
  0x69   :  { %781 = vmatpush1.bf16.msra.mxu0 %v1460_v39  ;;  %v1535_v39 = vld [vmem:[#allocation5 + $0x2b0] ss:$8 sps:$4 sm:$0xff]  }
  0x6a   :  { %782 = vmatprep.subr.bf16.mxu0 %v1461_v40  ;;  %v1543_v40 = vld [vmem:[#allocation5 + $0x2c4] ss:$8 sps:$4 sm:$0xff]  }
  0x6b   :  { %736 = vmatpush1.bf16.msra.mxu1 %v1550_v63  ;;  %v1742_v63 = vmov 0  }
  0x6c   :  { %737 = vmatprep.subr.bf16.mxu1 %v1551_v1  ;;  %v1617_v1 = vld [vmem:[#allocation7 + $0xc4] ss:$8 sps:$4 sm:$0xff]  }
  0x6d   :  { %783 = vmatpush1.bf16.msra.mxu0 %v1463_v43  ;;  %v1541_v43 = vld [vmem:[#allocation5 + $0x2c0] ss:$8 sps:$4 sm:$0xff]  }
  0x6e   :  { %784 = vmatprep.subr.bf16.mxu0 %v1464_v44  ;;  %v1549_v44 = vld [vmem:[#allocation5 + $0x2d4] ss:$8 sps:$4 sm:$0xff]  }
  0x6f   :  { %738 = vmatpush1.bf16.msra.mxu1 %v1556_v4  ;;  %v1618_v4 = vld [vmem:[#allocation7 + $0xd0] ss:$8 sps:$4 sm:$0xff]  }
  0x70   :  { %739 = vmatprep.subr.bf16.mxu1 %v1557_v5  ;;  %v1620_v5 = vld [vmem:[#allocation7 + $0xd4] ss:$8 sps:$4 sm:$0xff]  }
  0x71   :  { %785 = vmatpush1.bf16.msra.mxu0 %v1466_v47  ;;  %v1547_v47 = vld [vmem:[#allocation5 + $0x2d0] ss:$8 sps:$4 sm:$0xff]  }
  0x72   :  { %786 = vmatprep.subr.bf16.mxu0 %v1467_v48  ;;  %v1555_v48 = vld [vmem:[#allocation5 + $0x2e4] ss:$8 sps:$4 sm:$0xff]  }
  0x73   :  { %740 = vmatpush1.bf16.msra.mxu1 %v1562_v8  ;;  %v1626_v8 = vld [vmem:[#allocation7 + $0xf4] ss:$8 sps:$4 sm:$0xff]  }
  0x74   :  { %741 = vmatprep.subr.bf16.mxu1 %v1566_v9  ;;  %v1624_v9 = vld [vmem:[#allocation7 + $0xf0] ss:$8 sps:$4 sm:$0xff]  }
  0x75   :  { %787 = vmatpush1.bf16.msra.mxu0 %v1469_v51  ;;  %v1553_v51 = vld [vmem:[#allocation5 + $0x2e0] ss:$8 sps:$4 sm:$0xff]  }
  0x76   :  { %799 = vmatprep.subr.bf16.mxu0 %v1475_v52  ;;  %v1561_v52 = vld [vmem:[#allocation5 + $0x2f4] ss:$8 sps:$4 sm:$0xff]  }
  0x77   :  { %742 = vmatpush1.bf16.msra.mxu1 %v1571_v12 }
  0x78   :  { %789 = vmatmul.mubr.bf16.vlgmr.msra.gmra.mrb[0].mxu0 %v1470_v54  ;;  %743 = vmatprep.subr.bf16.mxu1 %v1572_v13  ;;  %v1608_v54 = vld [vmem:[#allocation7 + $0x94] ss:$8 sps:$4 sm:$0xff]  }
  0x79   :  { %800 = vmatpush1.bf16.msra.mxu0 %v1473_v56  ;;  %831 = vmatprep.mubr.bf16.mxu0 %v1565_v57  ;;  %v1570_v56 = vld [vmem:[#allocation5 + $0x304] ss:$8 sps:$4 sm:$0xff]   ;;  %v1606_v57 = vld [vmem:[#allocation7 + $0x90] ss:$8 sps:$4 sm:$0xff]  }
  0x7a   :  { %801 = vmatprep.subr.bf16.mxu0 %v1478_v58  ;;  %v1563_v58 = vld [vmem:[#allocation2 + $0x10] ss:$28 sps:$4 sm:$0xff]  }
  0x7b   :  { %744 = vmatpush1.bf16.msra.mxu1 %v1574_v17  ;;  %v172_v17 = vld [vmem:[%s1849_s2] sm:$0x3] }
  0x7c   :  { %1095 = vmatprep.subr.bf16.mxu1 %v1581_v18 }
  0x7d   :  { %802 = vmatpush1.bf16.msra.mxu0 %v1476_v61  ;;  %v1609_v61 = vld [vmem:[#allocation7 + $0xa0] ss:$8 sps:$4 sm:$0xff]  }
  0x7e   :  { %803 = vmatprep.subr.bf16.mxu0 %v1483_v62  ;;  %746 = vmatmul.mubr.bf16.vlgmr.msra.gmra.mrb[0].mxu1 %v1575_v20  ;;  %v1614_v62 = vld [vmem:[#allocation7 + $0xb4] ss:$8 sps:$4 sm:$0xff]  }
  0x7f   :  { %1096 = vmatpush1.bf16.msra.mxu1 %v1579_v21 }
  0x80   :  { %1097 = vmatprep.subr.bf16.mxu1 %v1584_v22 }
  0x81   :  { %804 = vmatpush1.bf16.msra.mxu0 %v1481_v2  ;;  %v1615_v2 = vld [vmem:[#allocation7 + $0xc0] ss:$8 sps:$4 sm:$0xff]  }
  0x82   :  { %805 = vmatprep.subr.bf16.mxu0 %v1489_v3  ;;  %v1578_v3 = vld [vmem:[#allocation2 + $0x18] ss:$28 sps:$4 sm:$0xff]  }
  0x83   :  { %1098 = vmatpush1.bf16.msra.mxu1 %v1582_v25 }
  0x84   :  { %1099 = vmatprep.subr.bf16.mxu1 %v1587_v26 }
  0x85   :  { %806 = vmatpush1.bf16.msra.mxu0 %v1487_v6  ;;  %v1623_v6 = vld [vmem:[#allocation7 + $0xe4] ss:$8 sps:$4 sm:$0xff]  }
  0x86   :  { %807 = vmatprep.subr.bf16.mxu0 %v1495_v7  ;;  %v1621_v7 = vld [vmem:[#allocation7 + $0xe0] ss:$8 sps:$4 sm:$0xff]  }
  0x87   :  { %1100 = vmatpush1.bf16.msra.mxu1 %v1585_v29 }
  0x88   :  { %1101 = vmatprep.subr.bf16.mxu1 %v1590_v30 }
  0x89   :  { %808 = vmatpush1.bf16.msra.mxu0 %v1493_v10 }
  0x8a   :  { %809 = vmatprep.subr.bf16.mxu0 %v1501_v11 }
  0x8b   :  { %1102 = vmatpush1.bf16.msra.mxu1 %v1588_v33 }
  0x8c   :  { %1103 = vmatprep.subr.bf16.mxu1 %v1593_v34 }
  0x8d   :  { %810 = vmatpush1.bf16.msra.mxu0 %v1499_v14  ;;  %v174_v14 = vlaneseq }
  0x8e   :  { %811 = vmatprep.subr.bf16.mxu0 %v1507_v15 }
  0x8f   :  { %1104 = vmatpush1.bf16.msra.mxu1 %v1591_v37  ;;  %v1821_v15 = vshrl.u32 %v174_v14, 7 }
  0x90   :  { %1105 = vmatprep.subr.bf16.mxu1 %v1596_v38 }
  0x91   :  { %812 = vmatpush1.bf16.msra.mxu0 %v1505_v16  ;;  %v176_v16 = vsub.s32 0, %v1821_v15  ;;  %v180_v18 = vsub.s32 1, %v1821_v15  ;;  %vm1236_vm1 = vcmp.lt.s32.totalorder %v1821_v15, 2 }
  0x92   :  { %813 = vmatprep.subr.bf16.mxu0 %v1513_v19 }
  0x93   :  { %1106 = vmatpush1.bf16.msra.mxu1 %v1594_v41  ;;  %v177_v19 = vrot.slane %v172_v17, %v176_v16  ;;  %v181_v20 = vrot.slane %v172_v17, %v180_v18 }
  0x94   :  { %1107 = vmatprep.subr.bf16.mxu1 %v1599_v42 }
  0x95   :  { %814 = vmatpush1.bf16.msra.mxu0 %v1511_v23 }
  0x96   :  { %815 = vmatprep.subr.bf16.mxu0 %v1519_v24 }
  0x97   :  { %1108 = vmatpush1.bf16.msra.mxu1 %v1597_v45 }
  0x98   :  { %1109 = vmatprep.subr.bf16.mxu1 %v1602_v46 }
  0x99   :  { %816 = vmatpush1.bf16.msra.mxu0 %v1517_v27 }
  0x9a   :  { %817 = vmatprep.subr.bf16.mxu0 %v1525_v28 }
  0x9b   :  { %1110 = vmatpush1.bf16.msra.mxu1 %v1600_v49 }
  0x9c   :  { %1111 = vmatprep.subr.bf16.mxu1 %v1605_v50 }
  0x9d   :  { %818 = vmatpush1.bf16.msra.mxu0 %v1523_v31 }
  0x9e   :  { %819 = vmatprep.subr.bf16.mxu0 %v1531_v32 }
  0x9f   :  { %1112 = vmatpush1.bf16.msra.mxu1 %v1603_v53 }
  0xa0   :  { %1113 = vmatprep.subr.bf16.mxu1 %v1608_v54 }
  0xa1   :  { %820 = vmatpush1.bf16.msra.mxu0 %v1529_v35 }
  0xa2   :  { %821 = vmatprep.subr.bf16.mxu0 %v1537_v36 }
  0xa3   :  { %1114 = vmatpush1.bf16.msra.mxu1 %v1606_v57 }
  0xa4   :  { %1115 = vmatprep.subr.bf16.mxu1 %v1611_v59 }
  0xa5   :  { %822 = vmatpush1.bf16.msra.mxu0 %v1535_v39  ;;  %v923_v39 = vld [vmem:[%s1851_s4] sm:$0x3]  ;;  %s1743_s4 = smov [#allocation8]  }
  0xa6   :  { %823 = vmatprep.subr.bf16.mxu0 %v1543_v40  ;;  %v932_v40 = vrot.slane %v923_v39, %v180_v18  ;;  %v928_v54 = vrot.slane %v923_v39, %v176_v16 }
  0xa7   :  { %1116 = vmatpush1.bf16.msra.mxu1 %v1609_v61 }
  0xa8   :  { %1117 = vmatprep.subr.bf16.mxu1 %v1614_v62 }
  0xa9   :  { %824 = vmatpush1.bf16.msra.mxu0 %v1541_v43 }
  0xaa   :  { %825 = vmatprep.subr.bf16.mxu0 %v1549_v44 }
  0xab   :  { %1118 = vmatpush1.bf16.msra.mxu1 %v1612_v0 }
  0xac   :  { %1119 = vmatprep.subr.bf16.mxu1 %v1617_v1 }
  0xad   :  { %826 = vmatpush1.bf16.msra.mxu0 %v1547_v47 }
  0xae   :  { %827 = vmatprep.subr.bf16.mxu0 %v1555_v48 }
  0xaf   :  { %1120 = vmatpush1.bf16.msra.mxu1 %v1615_v2 }
  0xb0   :  { %1121 = vmatprep.subr.bf16.mxu1 %v1620_v5 }
  0xb1   :  { %828 = vmatpush1.bf16.msra.mxu0 %v1553_v51 }
  0xb2   :  { %829 = vmatprep.subr.bf16.mxu0 %v1561_v52  ;;  %v1396_v52 = vld [vmem:[%s1852_s5] ss:$0 sm:$0xff]  ;;  %s1248_s5 = sshll.u32 %s1743_s4, 4  ;;  %s1249_s5 = int_to_ptr.vmem [resolvable:$true] %s1248_s5 }
  0xb3   :  { %1122 = vmatpush1.bf16.msra.mxu1 %v1618_v4  ;;  %s1707_s15 = scalar_lea.vmem %s1249_s5, 128  ;;  %p1712_p11 = scmp.lt.s32.totalorder %s1249_s5, %s1249_s5 }
  0xb4   :  { %1123 = vmatprep.subr.bf16.mxu1 %v1623_v6  ;;  %p1708_p10 = scmp.ne.s32.totalorder %s1249_s5, %s1707_s15  ;;  %p1713_p12 = scmp.lt.s32.totalorder %s1707_s15, %s1707_s15 }
  0xb5   :  { %830 = vmatpush1.bf16.msra.mxu0 %v1559_v55 }
  0xb6   :  { %842 = vmatprep.subr.bf16.mxu0 %v1570_v56  ;;  %p1714_p13 = por %p1713_p12, %p1712_p11 }
  0xb7   :  { %1124 = vmatpush1.bf16.msra.mxu1 %v1621_v7 }
  0xb8   :  { %832 = vmatmul.mubr.bf16.vlgmr.msra.gmra.mrb[0].mxu0 %v1563_v58  ;;  %1125 = vmatprep.subr.bf16.mxu1 %v1626_v8  ;;  %p1715_p0 = pnand %p1714_p13, %p1708_p10 }
  0xb9   :  { %843 = vmatpush1.bf16.msra.mxu0 %v1568_v60  ;;  %874 = vmatprep.mubr.bf16.mxu0 %v1742_v63 }
  0xbb   :  { %1126 = vmatpush1.bf16.msra.mxu1 %v1624_v9 }
  0xc4   :  { %1363 = vmatmul.mubr.msk.bf16.vlgmr.msra.gmra.mrb[0].mxu0 %vm709_vm0, %v1578_v3 }
 0x151   :  { %v747_v10 = vpop.f32.mrb[0].mxu1 }
 0x152   :  { %v749_v11 = vpop.f32.mrb[1].mxu1  ;;  %v748_v21 = vadd.f32 %v747_v10, %v177_v19 }
 0x153   :  { %v751_v12 = vpop.f32.mrb[2].mxu1  ;;  %v750_v22 = vadd.f32 %v749_v11, %v181_v20 }
 0x154   :  { %v753_v13 = vpop.f32.mrb[3].mxu1  ;;  %v752_v24 = vadd.f32 %v751_v12, %v177_v19 }
 0x155   :  { %v754_v27 = vadd.f32 %v753_v13, %v181_v20 }
 0x197   :  { %v876_v23 = vpop.f32.mrb[0].mxu0 }
 0x198   :  { %v1398_v25 = vadd.f32 %v876_v23, %v748_v21  ;;  %v878_v26 = vpop.f32.mrb[1].mxu0 }
 0x199   :  { %v1400_v28 = vadd.f32 %v878_v26, %v750_v22  ;;  %v880_v29 = vpop.f32.mrb[2].mxu0 }
 0x19a   :  { %v1402_v30 = vadd.f32 %v880_v29, %v752_v24  ;;  %v882_v31 = vpop.f32.mrb[3].mxu0  ;;  %v885_v33 = vmax.f32 %v1398_v25, 0.0 }
 0x19b   :  { %v1404_v32 = vadd.f32 %v882_v31, %v754_v27  ;;  %v886_v35 = vmax.f32 %v1400_v28, 0.0 }
 0x19c   :  { %v887_v34 = vmax.f32 %v1402_v30, 0.0 }
 0x19d   :  { %v888_v36 = vmax.f32 %v1404_v32, 0.0 }
 0x19e   :  { %v889_v37 = vpack.c.bf16 %v887_v34, %v885_v33 }
 0x19f   :  { %v890_v38 = vpack.c.bf16 %v888_v36, %v886_v35 }
 0x1a1   :  { %1127 = vmatprep.mubr.bf16.mxu1 %v890_v38 }
 0x1a2   :  { %1128 = vmatmul.mubr.bf16.vlgmr.msra.gmra.mrb[4].mxu1 %v889_v37 }
 0x275   :  { %v1129_v41 = vpop.f32.mrb[4].mxu1 }
 0x276   :  { %v1131_v42 = vpop.f32.mrb[5].mxu1  ;;  %v1130_v56 = vadd.f32 %v1129_v41, %v928_v54 }
 0x277   :  { %v1132_v43 = vadd.f32 %v1131_v42, %v932_v40  ;;  %v1133_v44 = vpop.f32.mrb[6].mxu1 }
 0x278   :  { %v1135_v45 = vpop.f32.mrb[7].mxu1 }
 0x279   :  { %1162 = vmax.xlane.f32.xlu0 %v1132_v43 }
 0x306   :  { %v1163_v46 = vpop.xlane.xlu0 %1162 }
 0x307   :  { %v1166_v47 = vsub.f32 %v1132_v43, %v1163_v46 }
 0x309   :  { %v1168_v48 = vmul.f32 1.442695, %v1166_v47 }
 0x30b   :  { %1627 = vpow2.f32 %v1168_v48 }
 0x315   :  { %v1628_v49 = vpop.eup %1627 }
 0x316   :  { %1172 = vadd.xlane.f32.xlu0 %v1628_v49 }
 0x3a3   :  { %v1173_v50 = vpop.xlane.xlu0 %1172 }
 0x3a4   :  { %1629 = vrcp.f32 %v1173_v50 }
 0x3ae   :  { %v1630_v51 = vpop.eup %1629 }
 0x3af   :  { %v1177_v53 = vmul.f32 %v1630_v51, %v1628_v49 }
 0x3b1   :  { %v1187_v55 = vadd.f32 %v1396_v52, %v1177_v53 }
 0x3b3   :  { %1189 = vmax.xlane.f32.xlu1 %v1187_v55 }
 0x3b7   :  { %1138 = vmax.xlane.f32.xlu1 %v1130_v56 }
 0x440   :  { %v1190_v57 = vpop.xlane.xlu1 %1189 }
 0x441   :  { %v1193_v58 = vsub.f32 %v1187_v55, %v1190_v57 }
 0x443   :  { %v1195_v59 = vmul.f32 1.442695, %v1193_v58 }
 0x444   :  { %v1139_v60 = vpop.xlane.xlu1 %1138 }
 0x445   :  { %1631 = vpow2.f32 %v1195_v59  ;;  %v1142_v61 = vsub.f32 %v1130_v56, %v1139_v60 }
 0x447   :  { %v1144_v62 = vmul.f32 1.442695, %v1142_v61 }
 0x449   :  { %1633 = vpow2.f32 %v1144_v62 }
 0x44f   :  { %v1632_v63 = vpop.eup %1631 }
 0x450   :  { %1199 = vadd.xlane.f32.xlu0 %v1632_v63 }
 0x453   :  { %v1634_v0 = vpop.eup %1633 }
 0x454   :  { %1148 = vadd.xlane.f32.xlu1 %v1634_v0 }
 0x4dd   :  { %v1200_v1 = vpop.xlane.xlu0 %1199 }
 0x4de   :  { %1635 = vlog2.f32 %v1200_v1 }
 0x4e1   :  { %v1149_v2 = vpop.xlane.xlu1 %1148 }
 0x4e2   :  { %1637 = vlog2.f32 %v1149_v2 }
 0x4e3   :  { %1639 = vrcp.f32 %v1149_v2 }
 0x4e8   :  { %v1636_v3 = vpop.eup %1635 }
 0x4e9   :  { %v1204_v4 = vmul.f32 0.6931472, %v1636_v3 }
 0x4eb   :  { %v1207_v5 = vadd.f32 %v1204_v4, %v1190_v57 }
 0x4ec   :  { %v1638_v6 = vpop.eup %1637 }
 0x4ed   :  { %v1640_v7 = vpop.eup %1639  ;;  %v1157_v8 = vmul.f32 0.6931472, %v1638_v6  ;;  %v1209_v9 = vsub.f32 %v1177_v53, %v1207_v5 }
 0x4ee   :  { %v1153_v11 = vmul.f32 %v1640_v7, %v1634_v0 }
 0x4ef   :  { %v1160_v10 = vsub.f32 %v1142_v61, %v1157_v8 }
 0x4f0   :  { %vm1211_vm2 = vcmp.gt.f32.partialorder %v1153_v11, 0.0 }
 0x4f1   :  { %v1213_v12 = vsub.f32 %v1160_v10, %v1209_v9 }
 0x4f3   :  { %v1215_v13 = vmul.f32 %v1213_v12, %v1153_v11 }
 0x4f5   :  { %v1217_v14 = vsel %vm1211_vm2, %v1215_v13, 0.0 }
 0x4f6   :  { %v1238_v16 = vsel %vm1236_vm1, %v1217_v14, 0.0 }
 0x4f7   :  { %1241 = vst [vmem:[#allocation8] sm:$0xff] %v1238_v16 }
 0x4f8   :  { %1718 = shalt.err (!%p1715_p0)
}
 0x4f9   :  { %s1719_s18 = scalar_lea.hbm %s1853_s6, 128 }
 0x4fa   :  { %p1720_p1 = scmp.ne.s32.totalorder %s1853_s6, %s1719_s18  ;;  %p1723_p2 = scmp.lt.u32.totalorder %s1719_s18, %s1853_s6 }
 0x4fc   :  { %p1725_p3 = pnand %p1723_p2, %p1720_p1 }
 0x4fe   :  { %1728 = shalt.err (!%p1725_p3)
}
 0x4ff   :  { %1251 = dma.vmem_to_hbm [thread:$0]  %s1249_s5, 128, %s1853_s6, [#allocation4]  }
 0x500   :  { %1733 = dma.done.wait [#allocation4], 128  }
 0x501   :  { %1734 = vsyncadd [#allocation4], 4294967168 }
 0x502   :  { %1255 = vsyncpa [#allocation3], 1 }
 0x503   :  { %1256 = vsyncpa [#allocation6], 1 }
 0x504   :  { %1257 = vsyncpa [#allocation4], 1 }

</bundles_post_ra>
